<compile_context>
chip_gen: v5e
topology: v5e:2x2
jax: 0.10.0
libtpu: 0.0.40
codegen_flags: <defaults>
</compile_context>

<pallas_src>
import math

import jax
import jax.numpy as jnp
from jax import lax
from jax.experimental import pallas as pl
from jax.experimental.pallas import tpu as pltpu


def _round_up(x, m):
    return (x + m - 1) // m * m


def _vmem_capacity_bytes():
    """Best-effort per-core VMEM capacity, with a conservative fallback."""
    try:
        info = pltpu.get_tpu_info()
        cap = getattr(info, "vmem_capacity_bytes", None)
        if cap:
            return int(cap)
    except Exception:
        pass
    return 64 * 1024 * 1024  # v7x per-TensorCore physical VMEM (smallest gen)


def _to_bf16_planes(lut):
    """Split the table into bf16 planes whose sum reconstructs it (~f32 exact).

    A {0,1} one-hot matmul against bf16 operands with f32 accumulation is exact
    regardless of how many MXU passes the compiler picks, so gathering rows as
    sum_p(onehot @ plane_p) recovers the original table to ~1 ulp of f32
    without relying on f32-matmul precision flags.
    """
    if lut.dtype == jnp.bfloat16:
        return lut[None]
    resid = lut.astype(jnp.float32)
    planes = []
    for _ in range(3):  # 3 x 8 significand bits ~ full f32 mantissa
        p = resid.astype(jnp.bfloat16)
        planes.append(p)
        resid = resid - p.astype(jnp.float32)
    return jnp.stack(planes, axis=0)


# ---------------------------------------------------------------------------
# Path A: VMEM-resident table, vectorized one-hot MXU gather (small vocab).
# ---------------------------------------------------------------------------
def _make_onehot_resident_kernel(scale, vocab, n_planes, out_dtype):
    def kernel(ids_ref, lut_ref, out_ref):
        # ids_ref : VMEM (T, 1) int32 token ids for this block
        # lut_ref : VMEM (n_planes, vocab, d_model) bf16, resident across grid
        # out_ref : VMEM (T, d_model) output block
        ids = ids_ref[...]                                       # (T, 1)
        t = ids.shape[0]
        col = lax.broadcasted_iota(jnp.int32, (t, vocab), 1)     # (T, V)
        one_hot = (ids == col).astype(jnp.bfloat16)              # (T, V), exact 0/1
        acc = jnp.dot(one_hot, lut_ref[0], preferred_element_type=jnp.float32)
        for p in range(1, n_planes):                             # static unroll (<=3)
            acc = acc + jnp.dot(one_hot, lut_ref[p],
                                preferred_element_type=jnp.float32)
        out_ref[...] = (acc * scale).astype(out_dtype)           # dense vst

    return kernel


# ---------------------------------------------------------------------------
# Path B: HBM row-gather via manual async DMAs, pipelined across grid steps.
# ---------------------------------------------------------------------------
def _make_hbm_gather_kernel(scale, tokens_per_block, out_dtype):
    T = tokens_per_block

    def kernel(ids_ref, lut_hbm, out_ref, buf, sems):
        # ids_ref : SMEM (n_pad,) int32 (scalar-prefetched; data-dependent DMAs)
        # lut_hbm : raw HBM ref (vocab, d_model)     (memory_space=pl.ANY)
        # out_ref : VMEM (T, d_model) output block
        # buf     : VMEM (2, T, d_model) revolving gather buffer
        # sems    : (2,) DMA semaphores, one per buffer slot
        i = pl.program_id(0)
        nb = pl.num_programs(0)
        slot = lax.rem(i, 2)

        def issue_block(block_idx, dst_slot):
            base = block_idx * T

            def body(t, carry):
                tok = ids_ref[base + t]
                pltpu.make_async_copy(
                    lut_hbm.at[pl.ds(tok, 1), :],
                    buf.at[dst_slot, pl.ds(t, 1), :],
                    sems.at[dst_slot],
                ).start()
                return carry

            # Unrolled so scalar address math and descriptor pushes co-issue.
            lax.fori_loop(0, T, body, 0, unroll=8)

        # Prime the pipeline: block 0's rows are fetched at step 0.
        @pl.when(i == 0)
        def _prime():
            issue_block(0, 0)

        # Prefetch block i+1's rows into the other slot before waiting on ours.
        @pl.when(i + 1 < nb)
        def _prefetch_next():
            issue_block(i + 1, 1 - slot)

        # Single wait for all T row copies of this block: the descriptor byte
        # count (T * d_model * itemsize) equals the sum of the started copies.
        pltpu.make_async_copy(buf.at[slot], buf.at[slot], sems.at[slot]).wait()

        # Fused scale (in f32) + dense store of the output block.
        out_ref[...] = (buf[slot].astype(jnp.float32) * scale).astype(out_dtype)

    return kernel


# ---------------------------------------------------------------------------
# Wrapper: Embeddings.forward(x) = lut[x] * sqrt(d_model)
# ---------------------------------------------------------------------------
def embeddings_forward(ids, lut, *, block_bytes=2 * 1024 * 1024,
                       one_hot_vocab_max=2048, force_hbm_gather=False):
    vocab, d_model = lut.shape
    orig_shape = tuple(ids.shape)
    n = int(math.prod(orig_shape))
    itemsize = jnp.dtype(lut.dtype).itemsize
    scale = float(math.sqrt(d_model))

    # Bounds safety: never let a bad id drive an OOB gather/DMA.
    ids_flat = jnp.clip(ids.reshape(-1).astype(jnp.int32), 0, vocab - 1)

    # Generation-aware VMEM budgeting.
    vmem_cap = _vmem_capacity_bytes()
    vmem_limit = int(min(0.85 * vmem_cap, 100 * 1024 * 1024))

    n_planes = 1 if lut.dtype == jnp.bfloat16 else 3
    resident_table_bytes = n_planes * vocab * d_model * 2  # bf16 planes
    use_resident = ((not force_hbm_gather)
                    and vocab <= one_hot_vocab_max
                    and resident_table_bytes <= vmem_cap // 8)

    # Token-block size: aim for ~block_bytes per (T, d_model) output block
    # (>= ~1-2 MiB keeps writeback near the HBM roofline and amortizes the
    # ~0.35 us/grid-step overhead).
    T = max(8, _round_up(block_bytes // max(1, d_model * itemsize), 8))
    if use_resident:
        # Bound the in-kernel (T, vocab) iota/one-hot intermediates (~<= 8 MiB).
        t_cap = (8 * 1024 * 1024) // max(1, vocab * 8)
        T = min(T, max(8, (t_cap // 8) * 8))
    T = max(8, min(T, 4096))
    T = min(T, _round_up(n, 8))
    n_pad = _round_up(n, T)
    if n_pad != n:
        ids_flat = jnp.pad(ids_flat, (0, n_pad - n))  # padded ids are valid (0)
    n_blocks = n_pad // T

    if use_resident:
        # In a real module the bf16 planes would be computed once per table.
        lut_planes = _to_bf16_planes(lut)
        ids_col = ids_flat.reshape(n_pad, 1)

        def resident_call(lut_spec):
            return pl.pallas_call(
                _make_onehot_resident_kernel(scale, vocab, n_planes, lut.dtype),
                out_shape=jax.ShapeDtypeStruct((n_pad, d_model), lut.dtype),
                grid_spec=pltpu.PrefetchScalarGridSpec(
                    num_scalar_prefetch=0,
                    grid=(n_blocks,),
                    in_specs=[
                        pl.BlockSpec((T, 1), lambda i: (i, 0)),   # per-block ids
                        lut_spec,                                  # resident table
                    ],
                    out_specs=pl.BlockSpec((T, d_model), lambda i: (i, 0)),
                ),
                compiler_params=pltpu.CompilerParams(
                    dimension_semantics=("parallel",),
                    vmem_limit_bytes=vmem_limit,
                ),
            )(ids_col, lut_planes)

        lut_block = (n_planes, vocab, d_model)
        lut_idx = lambda i: (0, 0, 0)
        try:
            # Constant block index -> no point double-buffering the table.
            out_flat = resident_call(
                pl.BlockSpec(lut_block, lut_idx, pipeline_mode=pl.Buffered(1)))
        except Exception:
            # Fallback for runtimes without single-buffered pipeline_mode.
            out_flat = resident_call(pl.BlockSpec(lut_block, lut_idx))
    else:
        out_flat = pl.pallas_call(
            _make_hbm_gather_kernel(scale, T, lut.dtype),
            out_shape=jax.ShapeDtypeStruct((n_pad, d_model), lut.dtype),
            grid_spec=pltpu.PrefetchScalarGridSpec(
                num_scalar_prefetch=1,           # ids in SMEM (page-table style)
                grid=(n_blocks,),
                in_specs=[pl.BlockSpec(memory_space=pl.ANY)],   # raw HBM table
                out_specs=pl.BlockSpec((T, d_model), lambda i, ids_s: (i, 0)),
                scratch_shapes=[
                    pltpu.VMEM((2, T, d_model), lut.dtype),     # revolving buffer
                    pltpu.SemaphoreType.DMA((2,)),              # one sem per slot
                ],
            ),
            compiler_params=pltpu.CompilerParams(
                # Cross-step DMA pipelining carries state across grid steps.
                dimension_semantics=("arbitrary",),
                vmem_limit_bytes=vmem_limit,
            ),
        )(ids_flat, lut)

    return out_flat[:n].reshape(orig_shape + (d_model,))


if __name__ == "__main__":
    # Small, deterministic problem: batch=2, seq=8, vocab=64, d_model=128.
    B, S, VOCAB, D_MODEL = 2, 8, 64, 128

    key = jax.random.PRNGKey(0)
    k_lut, k_ids = jax.random.split(key)

    # nn.Embedding default init: N(0, 1)
    lut = jax.random.normal(k_lut, (VOCAB, D_MODEL), dtype=jnp.float32)
    ids = jax.random.randint(k_ids, (B, S), 0, VOCAB, dtype=jnp.int32)
    ref = jnp.take(lut, ids, axis=0) * math.sqrt(D_MODEL)

    # Path A: VMEM-resident one-hot MXU gather (auto-selected, small vocab).
    out_a = jax.block_until_ready(embeddings_forward(ids, lut))
    assert out_a.shape == (B, S, D_MODEL)
    assert jnp.allclose(out_a, ref, atol=1e-4, rtol=1e-4)

    # Path B: manual HBM row-gather DMA path (production-size vocab path).
    out_b = jax.block_until_ready(embeddings_forward(ids, lut, force_hbm_gather=True))
    assert out_b.shape == (B, S, D_MODEL)
    assert jnp.allclose(out_b, ref, atol=1e-4, rtol=1e-4)

    # Multi-block runs (small block_bytes => many grid steps) to exercise the
    # grid pipeline and Path B's cross-step DMA prefetch.
    ids2 = jax.random.randint(k_ids, (4, 64), 0, VOCAB, dtype=jnp.int32)
    ref2 = jnp.take(lut, ids2, axis=0) * math.sqrt(D_MODEL)

    out_a2 = jax.block_until_ready(
        embeddings_forward(ids2, lut, block_bytes=8 * 1024))
    assert out_a2.shape == (4, 64, D_MODEL)
    assert jnp.allclose(out_a2, ref2, atol=1e-4, rtol=1e-4)

    out_b2 = jax.block_until_ready(
        embeddings_forward(ids2, lut, block_bytes=8 * 1024, force_hbm_gather=True))
    assert out_b2.shape == (4, 64, D_MODEL)
    assert jnp.allclose(out_b2, ref2, atol=1e-4, rtol=1e-4)

    print("KERNEL_OK")
</pallas_src>

<mosaic_0001>
module attributes {stable_mosaic.version = 11 : i64} {
  func.func @kernel(%arg0: i32, %arg1: memref<16x1xi32, #tpu.memory_space<vmem>>, %arg2: memref<3x64x128xbf16, #tpu.memory_space<vmem>>, %arg3: memref<16x128xf32, #tpu.memory_space<vmem>>) attributes {dimension_semantics = [#tpu.dimension_semantics<parallel>], iteration_bounds = array<i64: 1>, scalar_prefetch = 0 : i64, scratch_operands = 0 : i64, tpu.core_type = #tpu.core_type<tc>, window_params = [{transform_indices = @transform_0, window_bounds = array<i64: 16, 1>}, {pipeline_mode = #tpu.pipeline_mode<synchronous>, transform_indices = @transform_1, window_bounds = array<i64: 3, 64, 128>}, {transform_indices = @transform_2, window_bounds = array<i64: 16, 128>}]} {
    %c0 = arith.constant 0 : index
    %c0_0 = arith.constant 0 : index
    %0 = vector.load %arg1[%c0, %c0_0] : memref<16x1xi32, #tpu.memory_space<vmem>>, vector<16x1xi32>
    %1 = tpu.iota {dimensions = array<i32: 1>} : vector<16x64xi32>
    %2 = vector.broadcast %0 : vector<16x1xi32> to vector<16x64xi32>
    %3 = arith.cmpi eq, %2, %1 : vector<16x64xi32>
    %4 = arith.extui %3 : vector<16x64xi1> to vector<16x64xi32>
    %5 = arith.sitofp %4 : vector<16x64xi32> to vector<16x64xf32>
    %6 = arith.truncf %5 : vector<16x64xf32> to vector<16x64xbf16>
    %c0_1 = arith.constant 0 : index
    %c0_2 = arith.constant 0 : index
    %c0_3 = arith.constant 0 : index
    %7 = vector.load %arg2[%c0_1, %c0_2, %c0_3] : memref<3x64x128xbf16, #tpu.memory_space<vmem>>, vector<1x64x128xbf16>
    %8 = vector.shape_cast %7 : vector<1x64x128xbf16> to vector<64x128xbf16>
    %cst = arith.constant dense<0.000000e+00> : vector<16x128xf32>
    %9 = tpu.matmul %6, %8, %cst {dimension_numbers = #tpu.dot_dimension_numbers<[1], [0], [0], [1], [0, 0, 1, 1], [], []>} : vector<16x64xbf16>, vector<64x128xbf16>, vector<16x128xf32> -> vector<16x128xf32>
    %c1 = arith.constant 1 : index
    %c0_4 = arith.constant 0 : index
    %c0_5 = arith.constant 0 : index
    %10 = vector.load %arg2[%c1, %c0_4, %c0_5] : memref<3x64x128xbf16, #tpu.memory_space<vmem>>, vector<1x64x128xbf16>
    %11 = vector.shape_cast %10 : vector<1x64x128xbf16> to vector<64x128xbf16>
    %cst_6 = arith.constant dense<0.000000e+00> : vector<16x128xf32>
    %12 = tpu.matmul %6, %11, %cst_6 {dimension_numbers = #tpu.dot_dimension_numbers<[1], [0], [0], [1], [0, 0, 1, 1], [], []>} : vector<16x64xbf16>, vector<64x128xbf16>, vector<16x128xf32> -> vector<16x128xf32>
    %13 = arith.addf %9, %12 : vector<16x128xf32>
    %c2 = arith.constant 2 : index
    %c0_7 = arith.constant 0 : index
    %c0_8 = arith.constant 0 : index
    %14 = vector.load %arg2[%c2, %c0_7, %c0_8] : memref<3x64x128xbf16, #tpu.memory_space<vmem>>, vector<1x64x128xbf16>
    %15 = vector.shape_cast %14 : vector<1x64x128xbf16> to vector<64x128xbf16>
    %cst_9 = arith.constant dense<0.000000e+00> : vector<16x128xf32>
    %16 = tpu.matmul %6, %15, %cst_9 {dimension_numbers = #tpu.dot_dimension_numbers<[1], [0], [0], [1], [0, 0, 1, 1], [], []>} : vector<16x64xbf16>, vector<64x128xbf16>, vector<16x128xf32> -> vector<16x128xf32>
    %17 = arith.addf %13, %16 : vector<16x128xf32>
    %cst_10 = arith.constant 11.3137083 : f32
    %18 = vector.broadcast %cst_10 : f32 to vector<16x128xf32>
    %19 = arith.mulf %17, %18 : vector<16x128xf32>
    %c0_11 = arith.constant 0 : index
    %c0_12 = arith.constant 0 : index
    %20 = vector.load %arg3[%c0_11, %c0_12] : memref<16x128xf32, #tpu.memory_space<vmem>>, vector<16x128xf32>
    tpu.vector_store %arg3[%c0_11, %c0_12], %19 {strides = array<i32>} : memref<16x128xf32, #tpu.memory_space<vmem>>, vector<16x128xf32>,
    return
  }
  func.func @transform_0(%arg0: i32) -> (i32, i32) {
    %c0_i32 = arith.constant 0 : i32
    %c0_i32_0 = arith.constant 0 : i32
    return %arg0, %c0_i32 : i32, i32
  }
  func.func @transform_1(%arg0: i32) -> (i32, i32, i32) {
    %c0_i32 = arith.constant 0 : i32
    %c0_i32_0 = arith.constant 0 : i32
    %c0_i32_1 = arith.constant 0 : i32
    %c0_i32_2 = arith.constant 0 : i32
    return %c0_i32, %c0_i32_0, %c0_i32_1 : i32, i32, i32
  }
  func.func @transform_2(%arg0: i32) -> (i32, i32) {
    %c0_i32 = arith.constant 0 : i32
    %c0_i32_0 = arith.constant 0 : i32
    return %arg0, %c0_i32 : i32, i32
  }
}

module attributes {stable_mosaic.version = 11 : i64} {
  func.func @kernel(%arg0: i32, %arg1: memref<16x1xi32, #tpu.memory_space<vmem>>, %arg2: memref<3x64x128xbf16, #tpu.memory_space<vmem>>, %arg3: memref<16x128xf32, #tpu.memory_space<vmem>>) attributes {dimension_semantics = [#tpu.dimension_semantics<parallel>], iteration_bounds = array<i64: 1>, scalar_prefetch = 0 : i64, scratch_operands = 0 : i64, tpu.core_type = #tpu.core_type<tc>, window_params = [{transform_indices = @transform_0, window_bounds = array<i64: 16, 1>}, {pipeline_mode = #tpu.pipeline_mode<synchronous>, transform_indices = @transform_1, window_bounds = array<i64: 3, 64, 128>}, {transform_indices = @transform_2, window_bounds = array<i64: 16, 128>}]} {
    %c0 = arith.constant 0 : index
    %c0_0 = arith.constant 0 : index
    %0 = vector.load %arg1[%c0, %c0_0] : memref<16x1xi32, #tpu.memory_space<vmem>>, vector<16x1xi32>
    %1 = tpu.iota {dimensions = array<i32: 1>} : vector<16x64xi32>
    %2 = vector.broadcast %0 : vector<16x1xi32> to vector<16x64xi32>
    %3 = arith.cmpi eq, %2, %1 : vector<16x64xi32>
    %4 = arith.extui %3 : vector<16x64xi1> to vector<16x64xi32>
    %5 = arith.sitofp %4 : vector<16x64xi32> to vector<16x64xf32>
    %6 = arith.truncf %5 : vector<16x64xf32> to vector<16x64xbf16>
    %c0_1 = arith.constant 0 : index
    %c0_2 = arith.constant 0 : index
    %c0_3 = arith.constant 0 : index
    %7 = vector.load %arg2[%c0_1, %c0_2, %c0_3] : memref<3x64x128xbf16, #tpu.memory_space<vmem>>, vector<1x64x128xbf16>
    %8 = vector.shape_cast %7 : vector<1x64x128xbf16> to vector<64x128xbf16>
    %cst = arith.constant dense<0.000000e+00> : vector<16x128xf32>
    %9 = tpu.matmul %6, %8, %cst {dimension_numbers = #tpu.dot_dimension_numbers<[1], [0], [0], [1], [0, 0, 1, 1], [], []>} : vector<16x64xbf16>, vector<64x128xbf16>, vector<16x128xf32> -> vector<16x128xf32>
    %c1 = arith.constant 1 : index
    %c0_4 = arith.constant 0 : index
    %c0_5 = arith.constant 0 : index
    %10 = vector.load %arg2[%c1, %c0_4, %c0_5] : memref<3x64x128xbf16, #tpu.memory_space<vmem>>, vector<1x64x128xbf16>
    %11 = vector.shape_cast %10 : vector<1x64x128xbf16> to vector<64x128xbf16>
    %cst_6 = arith.constant dense<0.000000e+00> : vector<16x128xf32>
    %12 = tpu.matmul %6, %11, %cst_6 {dimension_numbers = #tpu.dot_dimension_numbers<[1], [0], [0], [1], [0, 0, 1, 1], [], []>} : vector<16x64xbf16>, vector<64x128xbf16>, vector<16x128xf32> -> vector<16x128xf32>
    %13 = arith.addf %9, %12 : vector<16x128xf32>
    %c2 = arith.constant 2 : index
    %c0_7 = arith.constant 0 : index
    %c0_8 = arith.constant 0 : index
    %14 = vector.load %arg2[%c2, %c0_7, %c0_8] : memref<3x64x128xbf16, #tpu.memory_space<vmem>>, vector<1x64x128xbf16>
    %15 = vector.shape_cast %14 : vector<1x64x128xbf16> to vector<64x128xbf16>
    %cst_9 = arith.constant dense<0.000000e+00> : vector<16x128xf32>
    %16 = tpu.matmul %6, %15, %cst_9 {dimension_numbers = #tpu.dot_dimension_numbers<[1], [0], [0], [1], [0, 0, 1, 1], [], []>} : vector<16x64xbf16>, vector<64x128xbf16>, vector<16x128xf32> -> vector<16x128xf32>
    %17 = arith.addf %13, %16 : vector<16x128xf32>
    %cst_10 = arith.constant 11.3137083 : f32
    %18 = vector.broadcast %cst_10 : f32 to vector<16x128xf32>
    %19 = arith.mulf %17, %18 : vector<16x128xf32>
    %c0_11 = arith.constant 0 : index
    %c0_12 = arith.constant 0 : index
    %20 = vector.load %arg3[%c0_11, %c0_12] : memref<16x128xf32, #tpu.memory_space<vmem>>, vector<16x128xf32>
    tpu.vector_store %arg3[%c0_11, %c0_12], %19 {strides = array<i32>} : memref<16x128xf32, #tpu.memory_space<vmem>>, vector<16x128xf32>,
    return
  }
  func.func @transform_0(%arg0: i32) -> (i32, i32) {
    %c0_i32 = arith.constant 0 : i32
    %c0_i32_0 = arith.constant 0 : i32
    return %arg0, %c0_i32 : i32, i32
  }
  func.func @transform_1(%arg0: i32) -> (i32, i32, i32) {
    %c0_i32 = arith.constant 0 : i32
    %c0_i32_0 = arith.constant 0 : i32
    %c0_i32_1 = arith.constant 0 : i32
    %c0_i32_2 = arith.constant 0 : i32
    return %c0_i32, %c0_i32_0, %c0_i32_1 : i32, i32, i32
  }
  func.func @transform_2(%arg0: i32) -> (i32, i32) {
    %c0_i32 = arith.constant 0 : i32
    %c0_i32_0 = arith.constant 0 : i32
    return %arg0, %c0_i32 : i32, i32
  }
}

</mosaic_0001>

<bundles_post_ra>
// kernel: tpu_custom_call.1
= control target key start
LH: loop header
LB: loop body
LE: loop exit
PB: predicated region body
PF: predicated region fallthrough
CT: control target
= control target key end

     0   :  { %7 = vsyncpa [#allocation3], 0  ;;  %s376_s0 = inlined_call_operand.vmem [shape: s32[16,1], index: 0, kind: input, shape index: {}]   ;;  %s377_s1 = inlined_call_operand.hbm [shape: bf16[3,64,128], index: 1, kind: input, shape index: {}]   ;;  %s378_s2 = inlined_call_operand.hbm [shape: f32[16,128], index: 2, kind: output, shape index: {}]  }
   0x1   :  { %8 = vsyncpa [#allocation4], 0  ;;  %s15_s11 = sshll.u32 %s377_s1, 4  ;;  %s341_s12 = smov [#allocation2]   ;;  %s16_s11 = int_to_ptr.hbm [resolvable:$true] %s15_s11 }
   0x2   :  { %s17_s13 = sshll.u32 %s341_s12, 4  ;;  %s342_s14 = smov 64   ;;  %s18_s13 = int_to_ptr.vmem [resolvable:$true] %s17_s13 }
   0x3   :  { %s343_s15 = smov 4  }
   0x4   :  { %23 = dma.hbm_to_vmem [thread:$0]  %s16_s11, 1536, %s18_s13, [#allocation3], %s342_s14, %s342_s14, %s343_s15  }
   0x5   :  { %337 = dma.done.wait [#allocation3], 1536  }
   0x6   :  { %338 = vsyncadd [#allocation3], 4294965760  ;;  %v344_v0 = vmov 0   ;;  %v29_v1 = vld [vmem:[%s376_s0] sm:$0xff]  ;;  %v275_v2 = vld [vmem:[#allocation2 + $0x38] sm:$0xff]  ;;  %v31_v15 = vlaneseq  ;;  %v345_v19 = vmov 0.0  }
   0x7   :  { %288 = vset.pattern.permute.xlu0 %v344_v0  ;;  %v271_v3 = vld [vmem:[#allocation2 + $0x18] sm:$0xff]  ;;  %95 = vmatpush.bf16.msra.mxu0 %v275_v2  ;;  %v30_v5 = vld [vmem:[%s376_s0 + $0x8] sm:$0xff]  ;;  %v274_v6 = vld [vmem:[#allocation2 + $0x30] sm:$0xff]  ;;  %vm87_vm2 = vcmask 523264   ;;  %s346_s0 = smov [#allocation5]   ;;  %s202_s22 = sshll.u32 %s378_s2, 4  ;;  %s203_s22 = int_to_ptr.hbm [resolvable:$true] %s202_s22 }
   0x8   :  { %34 = vperm.xlu0 %288, %v29_v1   ;;  %v279_v4 = vld [vmem:[#allocation2 + $0x58] sm:$0xff]  ;;  %133 = vmatpush.bf16.msra.mxu1 %v271_v3  ;;  %v270_v7 = vld [vmem:[#allocation2 + $0x10] sm:$0xff]  ;;  %v273_v9 = vld [vmem:[#allocation2 + $0x28] sm:$0xff]  ;;  %v32_v17 = vand.u32 127, %v31_v15  ;;  %s200_s19 = sshll.u32 %s346_s0, 4  ;;  %s347_s23 = smov 128   ;;  %s201_s19 = int_to_ptr.vmem [resolvable:$true] %s200_s19 }
   0x9   :  { %180 = vmatpush.bf16.msra.mxu2 %v279_v4  ;;  %v278_v8 = vld [vmem:[#allocation2 + $0x50] sm:$0xff]  ;;  %v269_v10 = vld [vmem:[#allocation2 + $0x8] sm:$0xff]  ;;  %v272_v12 = vld [vmem:[#allocation2 + $0x20] sm:$0xff]  ;;  %s348_s24 = smov 8  }
   0xa   :  { %v277_v11 = vld [vmem:[#allocation2 + $0x48] sm:$0xff]  ;;  %v268_v13 = vld [vmem:[#allocation2] sm:$0xff] }
   0xb   :  { %96 = vmatpush.bf16.msra.mxu0 %v274_v6  ;;  %v276_v14 = vld [vmem:[#allocation2 + $0x40] sm:$0xff] }
   0xc   :  { %134 = vmatpush.bf16.msra.mxu1 %v270_v7 }
   0xd   :  { %181 = vmatpush.bf16.msra.mxu2 %v278_v8 }
   0xf   :  { %97 = vmatpush.bf16.msra.mxu0 %v273_v9 }
  0x10   :  { %37 = vperm.xlu0 %288, %v30_v5   ;;  %135 = vmatpush.bf16.msra.mxu1 %v269_v10 }
  0x11   :  { %182 = vmatpush.bf16.msra.mxu2 %v277_v11 }
  0x13   :  { %98 = vmatpush.bf16.msra.mxu0 %v272_v12 }
  0x14   :  { %136 = vmatpush.bf16.msra.mxu1 %v268_v13 }
  0x15   :  { %183 = vmatpush.bf16.msra.mxu2 %v276_v14 }
  0x7a   :  { %v35_v16 = vpop.permute.xlu0 %34 }
  0x7b   :  { %vm39_vm0 = vcmp.eq.s32.totalorder %v35_v16, %v32_v17 }
  0x7c   :  { %v215_v20 = vsel %vm39_vm0, 1.0, %v345_v19 }
  0x82   :  { %v38_v18 = vpop.permute.xlu0 %37 }
  0x83   :  { %vm40_vm1 = vcmp.eq.s32.totalorder %v38_v18, %v32_v17 }
  0x84   :  { %v216_v21 = vsel %vm40_vm1, 1.0, %v345_v19 }
  0x85   :  { %v45_v22 = vpack.c.bf16 %v216_v21, %v215_v20 }
  0x87   :  { %233 = vmatmul.msk.bf16.vlgmr.msra.gmra.mxu0 %vm87_vm2, %v45_v22  ;;  %250 = vmatmul.msk.bf16.vlgmr.msra.gmra.mxu1 %vm87_vm2, %v45_v22 }
  0x88   :  { %267 = vmatmul.msk.bf16.vlgmr.msra.gmra.mxu2 %vm87_vm2, %v45_v22 }
 0x104   :  { %v100_v23 = vpop.f32.mrf.mxu0  ;;  %v138_v24 = vpop.f32.mrf.mxu1 }
 0x105   :  { %v139_v25 = vadd.f32 %v138_v24, %v100_v23 }
 0x10b   :  { %v185_v26 = vpop.f32.mrf.mxu2 }
 0x10c   :  { %v190_v27 = vadd.f32 %v185_v26, %v139_v25  ;;  %v102_v29 = vpop.f32.mrf.mxu0  ;;  %v140_v30 = vpop.f32.mrf.mxu1 }
 0x10d   :  { %v141_v31 = vadd.f32 %v140_v30, %v102_v29 }
 0x10e   :  { %v192_v28 = vmul.f32 11.313708, %v190_v27 }
 0x110   :  { %194 = vst [vmem:[#allocation5] sm:$0xff] %v192_v28 }
 0x113   :  { %v187_v32 = vpop.f32.mrf.mxu2 }
 0x114   :  { %v191_v33 = vadd.f32 %v187_v32, %v141_v31 }
 0x116   :  { %v193_v34 = vmul.f32 11.313708, %v191_v33 }
 0x118   :  { %195 = vst [vmem:[#allocation5 + $0x8] sm:$0xff] %v193_v34 }
 0x119   :  { %208 = dma.vmem_to_hbm [thread:$0]  %s201_s19, 256, %s203_s22, [#allocation4], %s347_s23, %s347_s23, %s348_s24  }
 0x11a   :  { %339 = dma.done.wait [#allocation4], 256  }
 0x11b   :  { %340 = vsyncadd [#allocation4], 4294967040 }
 0x11c   :  { %213 = vsyncpa [#allocation3], 1 }
 0x11d   :  { %214 = vsyncpa [#allocation4], 1 }

// kernel: tpu_custom_call.1
= control target key start
LH: loop header
LB: loop body
LE: loop exit
PB: predicated region body
PF: predicated region fallthrough
CT: control target
= control target key end

     0   :  { %7 = vsyncpa [#allocation3], 0  ;;  %s376_s0 = inlined_call_operand.vmem [shape: s32[16,1], index: 0, kind: input, shape index: {}]   ;;  %s377_s1 = inlined_call_operand.hbm [shape: bf16[3,64,128], index: 1, kind: input, shape index: {}]   ;;  %s378_s2 = inlined_call_operand.hbm [shape: f32[16,128], index: 2, kind: output, shape index: {}]  }
   0x1   :  { %8 = vsyncpa [#allocation4], 0  ;;  %s15_s11 = sshll.u32 %s377_s1, 4  ;;  %s341_s12 = smov [#allocation2]   ;;  %s16_s11 = int_to_ptr.hbm [resolvable:$true] %s15_s11 }
   0x2   :  { %s17_s13 = sshll.u32 %s341_s12, 4  ;;  %s342_s14 = smov 64   ;;  %s18_s13 = int_to_ptr.vmem [resolvable:$true] %s17_s13 }
   0x3   :  { %s343_s15 = smov 4  }
   0x4   :  { %23 = dma.hbm_to_vmem [thread:$0]  %s16_s11, 1536, %s18_s13, [#allocation3], %s342_s14, %s342_s14, %s343_s15  }
   0x5   :  { %337 = dma.done.wait [#allocation3], 1536  }
   0x6   :  { %338 = vsyncadd [#allocation3], 4294965760  ;;  %v344_v0 = vmov 0   ;;  %v29_v1 = vld [vmem:[%s376_s0] sm:$0xff]  ;;  %v275_v2 = vld [vmem:[#allocation2 + $0x38] sm:$0xff]  ;;  %v31_v15 = vlaneseq  ;;  %v345_v19 = vmov 0.0  }
   0x7   :  { %288 = vset.pattern.permute.xlu0 %v344_v0  ;;  %v271_v3 = vld [vmem:[#allocation2 + $0x18] sm:$0xff]  ;;  %95 = vmatpush.bf16.msra.mxu0 %v275_v2  ;;  %v30_v5 = vld [vmem:[%s376_s0 + $0x8] sm:$0xff]  ;;  %v274_v6 = vld [vmem:[#allocation2 + $0x30] sm:$0xff]  ;;  %vm87_vm2 = vcmask 523264   ;;  %s346_s0 = smov [#allocation5]   ;;  %s202_s22 = sshll.u32 %s378_s2, 4  ;;  %s203_s22 = int_to_ptr.hbm [resolvable:$true] %s202_s22 }
   0x8   :  { %34 = vperm.xlu0 %288, %v29_v1   ;;  %v279_v4 = vld [vmem:[#allocation2 + $0x58] sm:$0xff]  ;;  %133 = vmatpush.bf16.msra.mxu1 %v271_v3  ;;  %v270_v7 = vld [vmem:[#allocation2 + $0x10] sm:$0xff]  ;;  %v273_v9 = vld [vmem:[#allocation2 + $0x28] sm:$0xff]  ;;  %v32_v17 = vand.u32 127, %v31_v15  ;;  %s200_s19 = sshll.u32 %s346_s0, 4  ;;  %s347_s23 = smov 128   ;;  %s201_s19 = int_to_ptr.vmem [resolvable:$true] %s200_s19 }
   0x9   :  { %180 = vmatpush.bf16.msra.mxu2 %v279_v4  ;;  %v278_v8 = vld [vmem:[#allocation2 + $0x50] sm:$0xff]  ;;  %v269_v10 = vld [vmem:[#allocation2 + $0x8] sm:$0xff]  ;;  %v272_v12 = vld [vmem:[#allocation2 + $0x20] sm:$0xff]  ;;  %s348_s24 = smov 8  }
   0xa   :  { %v277_v11 = vld [vmem:[#allocation2 + $0x48] sm:$0xff]  ;;  %v268_v13 = vld [vmem:[#allocation2] sm:$0xff] }
   0xb   :  { %96 = vmatpush.bf16.msra.mxu0 %v274_v6  ;;  %v276_v14 = vld [vmem:[#allocation2 + $0x40] sm:$0xff] }
   0xc   :  { %134 = vmatpush.bf16.msra.mxu1 %v270_v7 }
   0xd   :  { %181 = vmatpush.bf16.msra.mxu2 %v278_v8 }
   0xf   :  { %97 = vmatpush.bf16.msra.mxu0 %v273_v9 }
  0x10   :  { %37 = vperm.xlu0 %288, %v30_v5   ;;  %135 = vmatpush.bf16.msra.mxu1 %v269_v10 }
  0x11   :  { %182 = vmatpush.bf16.msra.mxu2 %v277_v11 }
  0x13   :  { %98 = vmatpush.bf16.msra.mxu0 %v272_v12 }
  0x14   :  { %136 = vmatpush.bf16.msra.mxu1 %v268_v13 }
  0x15   :  { %183 = vmatpush.bf16.msra.mxu2 %v276_v14 }
  0x7a   :  { %v35_v16 = vpop.permute.xlu0 %34 }
  0x7b   :  { %vm39_vm0 = vcmp.eq.s32.totalorder %v35_v16, %v32_v17 }
  0x7c   :  { %v215_v20 = vsel %vm39_vm0, 1.0, %v345_v19 }
  0x82   :  { %v38_v18 = vpop.permute.xlu0 %37 }
  0x83   :  { %vm40_vm1 = vcmp.eq.s32.totalorder %v38_v18, %v32_v17 }
  0x84   :  { %v216_v21 = vsel %vm40_vm1, 1.0, %v345_v19 }
  0x85   :  { %v45_v22 = vpack.c.bf16 %v216_v21, %v215_v20 }
  0x87   :  { %233 = vmatmul.msk.bf16.vlgmr.msra.gmra.mxu0 %vm87_vm2, %v45_v22  ;;  %250 = vmatmul.msk.bf16.vlgmr.msra.gmra.mxu1 %vm87_vm2, %v45_v22 }
  0x88   :  { %267 = vmatmul.msk.bf16.vlgmr.msra.gmra.mxu2 %vm87_vm2, %v45_v22 }
 0x104   :  { %v100_v23 = vpop.f32.mrf.mxu0  ;;  %v138_v24 = vpop.f32.mrf.mxu1 }
 0x105   :  { %v139_v25 = vadd.f32 %v138_v24, %v100_v23 }
 0x10b   :  { %v185_v26 = vpop.f32.mrf.mxu2 }
 0x10c   :  { %v190_v27 = vadd.f32 %v185_v26, %v139_v25  ;;  %v102_v29 = vpop.f32.mrf.mxu0  ;;  %v140_v30 = vpop.f32.mrf.mxu1 }
 0x10d   :  { %v141_v31 = vadd.f32 %v140_v30, %v102_v29 }
 0x10e   :  { %v192_v28 = vmul.f32 11.313708, %v190_v27 }
 0x110   :  { %194 = vst [vmem:[#allocation5] sm:$0xff] %v192_v28 }
 0x113   :  { %v187_v32 = vpop.f32.mrf.mxu2 }
 0x114   :  { %v191_v33 = vadd.f32 %v187_v32, %v141_v31 }
 0x116   :  { %v193_v34 = vmul.f32 11.313708, %v191_v33 }
 0x118   :  { %195 = vst [vmem:[#allocation5 + $0x8] sm:$0xff] %v193_v34 }
 0x119   :  { %208 = dma.vmem_to_hbm [thread:$0]  %s201_s19, 256, %s203_s22, [#allocation4], %s347_s23, %s347_s23, %s348_s24  }
 0x11a   :  { %339 = dma.done.wait [#allocation4], 256  }
 0x11b   :  { %340 = vsyncadd [#allocation4], 4294967040 }
 0x11c   :  { %213 = vsyncpa [#allocation3], 1 }
 0x11d   :  { %214 = vsyncpa [#allocation4], 1 }

</bundles_post_ra>
